<compile_context>
chip_gen: v5e
topology: v5e:2x2
jax: 0.10.0
libtpu: 0.0.40
codegen_flags: <defaults>
</compile_context>

<pallas_src>
import functools

import jax
import jax.numpy as jnp
from jax.experimental import pallas as pl
from jax.experimental.pallas import tpu as pltpu

HIDDEN = 128     # hidden width of feature_net (fixed by the PyTorch module)
HEAD_PAD = 128   # fused head output width: [mean (A) | value (1) | zero pad]


def _actor_critic_kernel(
    state_ref,    # [TB, S]        (tiled over batch, f32 or bf16)
    w1_ref,       # [S,  H]        bf16, resident
    w2_ref,       # [H,  H]        bf16, resident
    wh_ref,       # [H,  HEAD_PAD] bf16, resident (fused mean+value head, zero-padded)
    bias_ref,     # [3,  H]        f32, rows: b1, b2, fused-head bias (resident)
    heads_ref,    # out: [TB, HEAD_PAD] bf16 lane-dense slab: [:, :A]=mean, [:, A]=value
):
    x = state_ref[...].astype(jnp.bfloat16)
    b1 = bias_ref[0:1, :]
    b2 = bias_ref[1:2, :]
    bh = bias_ref[2:3, :]

    # feature_net: Linear -> ReLU -> Linear -> ReLU  (bf16 MXU matmuls, f32 accumulation)
    h1 = jnp.dot(x, w1_ref[...], preferred_element_type=jnp.float32) + b1
    h1 = jnp.maximum(h1, 0.0).astype(jnp.bfloat16)
    h2 = jnp.dot(h1, w2_ref[...], preferred_element_type=jnp.float32) + b2
    h2 = jnp.maximum(h2, 0.0).astype(jnp.bfloat16)

    # fused actor-mean + critic head: single 128-wide, lane-dense output store
    heads = jnp.dot(h2, wh_ref[...], preferred_element_type=jnp.float32) + bh
    heads_ref[...] = heads.astype(heads_ref.dtype)


def prepare_params(params):
    """One-time parameter preprocessing (keep OUT of the per-step hot path).

    Fuses actor_mean + critic into one zero-padded [H, 128] bf16 weight, packs all
    biases into a single [3, 128] f32 buffer, and casts feature weights to bf16.
    """
    f32 = jnp.float32
    H = params["w1"].shape[1]
    A = params["wm"].shape[1]
    assert H == HIDDEN == HEAD_PAD, "feature width fixed at 128 by the module"
    assert A + 1 <= HEAD_PAD, "action_dim + 1 must fit the 128-wide fused head"

    wh = jnp.zeros((H, HEAD_PAD), f32)
    wh = wh.at[:, :A].set(params["wm"]).at[:, A : A + 1].set(params["wc"])
    bh = jnp.zeros((1, HEAD_PAD), f32)
    bh = bh.at[:, :A].set(params["bm"]).at[:, A : A + 1].set(params["bc"])
    # NOTE: this concat only shape-checks because H == HEAD_PAD == 128 (asserted above).
    bias_pack = jnp.concatenate([params["b1"], params["b2"], bh], axis=0)  # [3, H] f32

    return dict(
        w1=params["w1"].astype(jnp.bfloat16),
        w2=params["w2"].astype(jnp.bfloat16),
        wh=wh.astype(jnp.bfloat16),
        bias=bias_pack.astype(f32),
        std=params["std"].astype(f32),  # [1, A]
    )


def _round_up(x, m):
    return ((x + m - 1) // m) * m


def _pick_batch_tile(B, num_cores=2):
    """Batch tile: multiple of 8, capped at 1024 rows, aiming for >= num_cores grid
    steps so the 'parallel' batch axis can shard across both v7x TensorCores."""
    if B <= 8:
        return B  # full-batch block (block dim == array dim is always legal)
    tb = min(1024, _round_up(pl.cdiv(B, num_cores), 8))
    return min(tb, _round_up(B, 8))


@functools.partial(jax.jit, static_argnames=("single_buffer_weights",))
def actor_critic_forward(state, prepped, single_buffer_weights=True):
    """ActorCritic forward pass in one Pallas kernel.

    state:   [B, state_dim] (f32; callers may pass bf16 to halve input DMA bytes)
    prepped: output of prepare_params()
    returns: (action_mean [B, A] f32, action_std [B, A] f32, value [B, 1] f32)
    """
    B, S = state.shape
    H = prepped["w1"].shape[1]
    A = prepped["std"].shape[1]

    TB = _pick_batch_tile(B)
    grid = (pl.cdiv(B, TB),)

    # Resident weights/biases: same block every grid step -> stay in VMEM; constant
    # index_map blocks don't need double buffers.
    resident_kwargs = dict(pipeline_mode=pl.Buffered(1)) if single_buffer_weights else {}

    def _zero(i):
        return (0, 0)

    def _batch(i):
        return (i, 0)

    in_specs = [
        pl.BlockSpec((TB, S), _batch),                          # state tile (pipelined)
        pl.BlockSpec((S, H), _zero, **resident_kwargs),         # w1 (bf16)
        pl.BlockSpec((H, H), _zero, **resident_kwargs),         # w2 (bf16)
        pl.BlockSpec((H, HEAD_PAD), _zero, **resident_kwargs),  # fused head weight (bf16)
        pl.BlockSpec((3, H), _zero, **resident_kwargs),         # packed biases (f32)
    ]
    out_specs = pl.BlockSpec((TB, HEAD_PAD), _batch)
    out_shape = jax.ShapeDtypeStruct((B, HEAD_PAD), jnp.bfloat16)

    flops = 2 * B * (S * H + H * H + H * HEAD_PAD)
    bytes_accessed = (
        state.dtype.itemsize * B * S
        + 2 * (S * H + H * H + H * HEAD_PAD)  # bf16 weights
        + 4 * 3 * H                           # f32 packed biases
        + 2 * B * HEAD_PAD                    # bf16 output slab
    )
    cost = pl.CostEstimate(flops=flops, transcendentals=0, bytes_accessed=bytes_accessed)

    heads = pl.pallas_call(
        _actor_critic_kernel,
        grid=grid,
        in_specs=in_specs,
        out_specs=out_specs,
        out_shape=out_shape,
        compiler_params=pltpu.CompilerParams(
            dimension_semantics=("parallel",),
            # Ample headroom even at TB=1024 (total usage ~2 MiB); explicit so v5e's
            # 16 MiB default scoped limit never becomes a constraint if shapes grow.
            vmem_limit_bytes=32 << 20,
        ),
        cost_estimate=cost,
    )(state, prepped["w1"], prepped["w2"], prepped["wh"], prepped["bias"])

    # lane-dense slab -> mean / value slices (cheap slices that fuse into consumers);
    # cast back to f32 for the PPO loss.
    action_mean = heads[:, :A].astype(jnp.float32)
    value = heads[:, A : A + 1].astype(jnp.float32)
    # actor_std is state-independent: broadcast outside the kernel (expand_as semantics)
    action_std = jnp.broadcast_to(prepped["std"], (B, A))
    return action_mean, action_std, value


def init_params(key, state_dim, action_dim, hidden=HIDDEN):
    """Deterministic parameter init (synthetic weights, not a checkpoint)."""
    ks = jax.random.split(key, 8)

    def linear(kw, kb, fan_in, fan_out):
        # mimic PyTorch nn.Linear default init scale: U(-1/sqrt(fan_in), 1/sqrt(fan_in))
        bound = 1.0 / jnp.sqrt(jnp.float32(fan_in))
        w = jax.random.uniform(kw, (fan_in, fan_out), jnp.float32, -bound, bound)
        b = jax.random.uniform(kb, (1, fan_out), jnp.float32, -bound, bound)
        return w, b

    w1, b1 = linear(ks[0], ks[1], state_dim, hidden)
    w2, b2 = linear(ks[2], ks[3], hidden, hidden)
    wm, bm = linear(ks[4], ks[5], hidden, action_dim)
    wc, bc = linear(ks[6], ks[7], hidden, 1)
    std = jnp.ones((1, action_dim), jnp.float32) * 0.1  # actor_std parameter
    return dict(w1=w1, b1=b1, w2=w2, b2=b2, wm=wm, bm=bm, wc=wc, bc=bc, std=std)


def actor_critic_ref(state, p):
    """Pure-JAX f32 reference for correctness checking."""
    h1 = jnp.maximum(state @ p["w1"] + p["b1"], 0.0)
    h2 = jnp.maximum(h1 @ p["w2"] + p["b2"], 0.0)
    mean = h2 @ p["wm"] + p["bm"]
    std = jnp.broadcast_to(p["std"], mean.shape)
    value = h2 @ p["wc"] + p["bc"]
    return mean, std, value


if __name__ == "__main__":
    B, STATE_DIM, ACTION_DIM = 8, 32, 8

    key = jax.random.PRNGKey(0)
    k_state, k_params = jax.random.split(key)

    state = jax.random.normal(k_state, (B, STATE_DIM), jnp.float32)
    params = init_params(k_params, STATE_DIM, ACTION_DIM, HIDDEN)
    prepped = prepare_params(params)  # one-time prep, outside the hot path

    try:
        outs = actor_critic_forward(state, prepped, single_buffer_weights=True)
        jax.block_until_ready(outs)
    except Exception:
        # Fallback if this JAX build rejects single-buffered resident BlockSpecs.
        outs = actor_critic_forward(state, prepped, single_buffer_weights=False)
        jax.block_until_ready(outs)
    mean, std, value = outs

    # sanity check against the pure-JAX f32 reference (bf16 MXU path -> looser tolerance)
    mean_r, std_r, value_r = actor_critic_ref(state, params)
    assert mean.shape == (B, ACTION_DIM)
    assert std.shape == (B, ACTION_DIM)
    assert value.shape == (B, 1)
    assert jnp.allclose(mean, mean_r, atol=5e-2, rtol=5e-2)
    assert jnp.allclose(std, std_r, atol=1e-6, rtol=1e-6)
    assert jnp.allclose(value, value_r, atol=5e-2, rtol=5e-2)

    print("KERNEL_OK")
</pallas_src>

<mosaic_0001>
module attributes {stable_mosaic.version = 11 : i64} {
  func.func @_actor_critic_kernel(%arg0: i32, %arg1: memref<8x32xf32, #tpu.memory_space<vmem>>, %arg2: memref<32x128xbf16, #tpu.memory_space<vmem>>, %arg3: memref<128x128xbf16, #tpu.memory_space<vmem>>, %arg4: memref<128x128xbf16, #tpu.memory_space<vmem>>, %arg5: memref<3x128xf32, #tpu.memory_space<vmem>>, %arg6: memref<8x128xbf16, #tpu.memory_space<vmem>>) attributes {dimension_semantics = [#tpu.dimension_semantics<parallel>], iteration_bounds = array<i64: 1>, scalar_prefetch = 0 : i64, scratch_operands = 0 : i64, tpu.core_type = #tpu.core_type<tc>, window_params = [{transform_indices = @transform_0, window_bounds = array<i64: 8, 32>}, {pipeline_mode = #tpu.pipeline_mode<synchronous>, transform_indices = @transform_1, window_bounds = array<i64: 32, 128>}, {pipeline_mode = #tpu.pipeline_mode<synchronous>, transform_indices = @transform_2, window_bounds = array<i64: 128, 128>}, {pipeline_mode = #tpu.pipeline_mode<synchronous>, transform_indices = @transform_3, window_bounds = array<i64: 128, 128>}, {pipeline_mode = #tpu.pipeline_mode<synchronous>, transform_indices = @transform_4, window_bounds = array<i64: 3, 128>}, {transform_indices = @transform_5, window_bounds = array<i64: 8, 128>}]} {
    %c0 = arith.constant 0 : index
    %c0_0 = arith.constant 0 : index
    %0 = vector.load %arg1[%c0, %c0_0] : memref<8x32xf32, #tpu.memory_space<vmem>>, vector<8x32xf32>
    %1 = arith.truncf %0 : vector<8x32xf32> to vector<8x32xbf16>
    %c0_1 = arith.constant 0 : index
    %c0_2 = arith.constant 0 : index
    %2 = vector.load %arg5[%c0_1, %c0_2] : memref<3x128xf32, #tpu.memory_space<vmem>>, vector<1x128xf32>
    %c1 = arith.constant 1 : index
    %c0_3 = arith.constant 0 : index
    %3 = vector.load %arg5[%c1, %c0_3] : memref<3x128xf32, #tpu.memory_space<vmem>>, vector<1x128xf32>
    %c2 = arith.constant 2 : index
    %c0_4 = arith.constant 0 : index
    %4 = vector.load %arg5[%c2, %c0_4] : memref<3x128xf32, #tpu.memory_space<vmem>>, vector<1x128xf32>
    %c0_5 = arith.constant 0 : index
    %c0_6 = arith.constant 0 : index
    %5 = vector.load %arg2[%c0_5, %c0_6] : memref<32x128xbf16, #tpu.memory_space<vmem>>, vector<32x128xbf16>
    %cst = arith.constant dense<0.000000e+00> : vector<8x128xf32>
    %6 = tpu.matmul %1, %5, %cst {dimension_numbers = #tpu.dot_dimension_numbers<[1], [0], [0], [1], [0, 0, 1, 1], [], []>} : vector<8x32xbf16>, vector<32x128xbf16>, vector<8x128xf32> -> vector<8x128xf32>
    %7 = vector.broadcast %2 : vector<1x128xf32> to vector<8x128xf32>
    %8 = arith.addf %6, %7 : vector<8x128xf32>
    %cst_7 = arith.constant 0.000000e+00 : f32
    %9 = vector.broadcast %cst_7 : f32 to vector<8x128xf32>
    %10 = arith.maximumf %8, %9 : vector<8x128xf32>
    %11 = arith.truncf %10 : vector<8x128xf32> to vector<8x128xbf16>
    %c0_8 = arith.constant 0 : index
    %c0_9 = arith.constant 0 : index
    %12 = vector.load %arg3[%c0_8, %c0_9] : memref<128x128xbf16, #tpu.memory_space<vmem>>, vector<128x128xbf16>
    %cst_10 = arith.constant dense<0.000000e+00> : vector<8x128xf32>
    %13 = tpu.matmul %11, %12, %cst_10 {dimension_numbers = #tpu.dot_dimension_numbers<[1], [0], [0], [1], [0, 0, 1, 1], [], []>} : vector<8x128xbf16>, vector<128x128xbf16>, vector<8x128xf32> -> vector<8x128xf32>
    %14 = vector.broadcast %3 : vector<1x128xf32> to vector<8x128xf32>
    %15 = arith.addf %13, %14 : vector<8x128xf32>
    %cst_11 = arith.constant 0.000000e+00 : f32
    %16 = vector.broadcast %cst_11 : f32 to vector<8x128xf32>
    %17 = arith.maximumf %15, %16 : vector<8x128xf32>
    %18 = arith.truncf %17 : vector<8x128xf32> to vector<8x128xbf16>
    %c0_12 = arith.constant 0 : index
    %c0_13 = arith.constant 0 : index
    %19 = vector.load %arg4[%c0_12, %c0_13] : memref<128x128xbf16, #tpu.memory_space<vmem>>, vector<128x128xbf16>
    %cst_14 = arith.constant dense<0.000000e+00> : vector<8x128xf32>
    %20 = tpu.matmul %18, %19, %cst_14 {dimension_numbers = #tpu.dot_dimension_numbers<[1], [0], [0], [1], [0, 0, 1, 1], [], []>} : vector<8x128xbf16>, vector<128x128xbf16>, vector<8x128xf32> -> vector<8x128xf32>
    %21 = vector.broadcast %4 : vector<1x128xf32> to vector<8x128xf32>
    %22 = arith.addf %20, %21 : vector<8x128xf32>
    %23 = arith.truncf %22 : vector<8x128xf32> to vector<8x128xbf16>
    %c0_15 = arith.constant 0 : index
    %c0_16 = arith.constant 0 : index
    %24 = vector.load %arg6[%c0_15, %c0_16] : memref<8x128xbf16, #tpu.memory_space<vmem>>, vector<8x128xbf16>
    tpu.vector_store %arg6[%c0_15, %c0_16], %23 {strides = array<i32>} : memref<8x128xbf16, #tpu.memory_space<vmem>>, vector<8x128xbf16>,
    return
  }
  func.func @transform_0(%arg0: i32) -> (i32, i32) {
    %c0_i32 = arith.constant 0 : i32
    %c0_i32_0 = arith.constant 0 : i32
    return %arg0, %c0_i32 : i32, i32
  }
  func.func @transform_1(%arg0: i32) -> (i32, i32) {
    %c0_i32 = arith.constant 0 : i32
    %c0_i32_0 = arith.constant 0 : i32
    %c0_i32_1 = arith.constant 0 : i32
    return %c0_i32, %c0_i32_0 : i32, i32
  }
  func.func @transform_2(%arg0: i32) -> (i32, i32) {
    %c0_i32 = arith.constant 0 : i32
    %c0_i32_0 = arith.constant 0 : i32
    %c0_i32_1 = arith.constant 0 : i32
    return %c0_i32, %c0_i32_0 : i32, i32
  }
  func.func @transform_3(%arg0: i32) -> (i32, i32) {
    %c0_i32 = arith.constant 0 : i32
    %c0_i32_0 = arith.constant 0 : i32
    %c0_i32_1 = arith.constant 0 : i32
    return %c0_i32, %c0_i32_0 : i32, i32
  }
  func.func @transform_4(%arg0: i32) -> (i32, i32) {
    %c0_i32 = arith.constant 0 : i32
    %c0_i32_0 = arith.constant 0 : i32
    %c0_i32_1 = arith.constant 0 : i32
    return %c0_i32, %c0_i32_0 : i32, i32
  }
  func.func @transform_5(%arg0: i32) -> (i32, i32) {
    %c0_i32 = arith.constant 0 : i32
    %c0_i32_0 = arith.constant 0 : i32
    return %arg0, %c0_i32 : i32, i32
  }
}

module attributes {stable_mosaic.version = 11 : i64} {
  func.func @_actor_critic_kernel(%arg0: i32, %arg1: memref<8x32xf32, #tpu.memory_space<vmem>>, %arg2: memref<32x128xbf16, #tpu.memory_space<vmem>>, %arg3: memref<128x128xbf16, #tpu.memory_space<vmem>>, %arg4: memref<128x128xbf16, #tpu.memory_space<vmem>>, %arg5: memref<3x128xf32, #tpu.memory_space<vmem>>, %arg6: memref<8x128xbf16, #tpu.memory_space<vmem>>) attributes {dimension_semantics = [#tpu.dimension_semantics<parallel>], iteration_bounds = array<i64: 1>, scalar_prefetch = 0 : i64, scratch_operands = 0 : i64, tpu.core_type = #tpu.core_type<tc>, window_params = [{transform_indices = @transform_0, window_bounds = array<i64: 8, 32>}, {pipeline_mode = #tpu.pipeline_mode<synchronous>, transform_indices = @transform_1, window_bounds = array<i64: 32, 128>}, {pipeline_mode = #tpu.pipeline_mode<synchronous>, transform_indices = @transform_2, window_bounds = array<i64: 128, 128>}, {pipeline_mode = #tpu.pipeline_mode<synchronous>, transform_indices = @transform_3, window_bounds = array<i64: 128, 128>}, {pipeline_mode = #tpu.pipeline_mode<synchronous>, transform_indices = @transform_4, window_bounds = array<i64: 3, 128>}, {transform_indices = @transform_5, window_bounds = array<i64: 8, 128>}]} {
    %c0 = arith.constant 0 : index
    %c0_0 = arith.constant 0 : index
    %0 = vector.load %arg1[%c0, %c0_0] : memref<8x32xf32, #tpu.memory_space<vmem>>, vector<8x32xf32>
    %1 = arith.truncf %0 : vector<8x32xf32> to vector<8x32xbf16>
    %c0_1 = arith.constant 0 : index
    %c0_2 = arith.constant 0 : index
    %2 = vector.load %arg5[%c0_1, %c0_2] : memref<3x128xf32, #tpu.memory_space<vmem>>, vector<1x128xf32>
    %c1 = arith.constant 1 : index
    %c0_3 = arith.constant 0 : index
    %3 = vector.load %arg5[%c1, %c0_3] : memref<3x128xf32, #tpu.memory_space<vmem>>, vector<1x128xf32>
    %c2 = arith.constant 2 : index
    %c0_4 = arith.constant 0 : index
    %4 = vector.load %arg5[%c2, %c0_4] : memref<3x128xf32, #tpu.memory_space<vmem>>, vector<1x128xf32>
    %c0_5 = arith.constant 0 : index
    %c0_6 = arith.constant 0 : index
    %5 = vector.load %arg2[%c0_5, %c0_6] : memref<32x128xbf16, #tpu.memory_space<vmem>>, vector<32x128xbf16>
    %cst = arith.constant dense<0.000000e+00> : vector<8x128xf32>
    %6 = tpu.matmul %1, %5, %cst {dimension_numbers = #tpu.dot_dimension_numbers<[1], [0], [0], [1], [0, 0, 1, 1], [], []>} : vector<8x32xbf16>, vector<32x128xbf16>, vector<8x128xf32> -> vector<8x128xf32>
    %7 = vector.broadcast %2 : vector<1x128xf32> to vector<8x128xf32>
    %8 = arith.addf %6, %7 : vector<8x128xf32>
    %cst_7 = arith.constant 0.000000e+00 : f32
    %9 = vector.broadcast %cst_7 : f32 to vector<8x128xf32>
    %10 = arith.maximumf %8, %9 : vector<8x128xf32>
    %11 = arith.truncf %10 : vector<8x128xf32> to vector<8x128xbf16>
    %c0_8 = arith.constant 0 : index
    %c0_9 = arith.constant 0 : index
    %12 = vector.load %arg3[%c0_8, %c0_9] : memref<128x128xbf16, #tpu.memory_space<vmem>>, vector<128x128xbf16>
    %cst_10 = arith.constant dense<0.000000e+00> : vector<8x128xf32>
    %13 = tpu.matmul %11, %12, %cst_10 {dimension_numbers = #tpu.dot_dimension_numbers<[1], [0], [0], [1], [0, 0, 1, 1], [], []>} : vector<8x128xbf16>, vector<128x128xbf16>, vector<8x128xf32> -> vector<8x128xf32>
    %14 = vector.broadcast %3 : vector<1x128xf32> to vector<8x128xf32>
    %15 = arith.addf %13, %14 : vector<8x128xf32>
    %cst_11 = arith.constant 0.000000e+00 : f32
    %16 = vector.broadcast %cst_11 : f32 to vector<8x128xf32>
    %17 = arith.maximumf %15, %16 : vector<8x128xf32>
    %18 = arith.truncf %17 : vector<8x128xf32> to vector<8x128xbf16>
    %c0_12 = arith.constant 0 : index
    %c0_13 = arith.constant 0 : index
    %19 = vector.load %arg4[%c0_12, %c0_13] : memref<128x128xbf16, #tpu.memory_space<vmem>>, vector<128x128xbf16>
    %cst_14 = arith.constant dense<0.000000e+00> : vector<8x128xf32>
    %20 = tpu.matmul %18, %19, %cst_14 {dimension_numbers = #tpu.dot_dimension_numbers<[1], [0], [0], [1], [0, 0, 1, 1], [], []>} : vector<8x128xbf16>, vector<128x128xbf16>, vector<8x128xf32> -> vector<8x128xf32>
    %21 = vector.broadcast %4 : vector<1x128xf32> to vector<8x128xf32>
    %22 = arith.addf %20, %21 : vector<8x128xf32>
    %23 = arith.truncf %22 : vector<8x128xf32> to vector<8x128xbf16>
    %c0_15 = arith.constant 0 : index
    %c0_16 = arith.constant 0 : index
    %24 = vector.load %arg6[%c0_15, %c0_16] : memref<8x128xbf16, #tpu.memory_space<vmem>>, vector<8x128xbf16>
    tpu.vector_store %arg6[%c0_15, %c0_16], %23 {strides = array<i32>} : memref<8x128xbf16, #tpu.memory_space<vmem>>, vector<8x128xbf16>,
    return
  }
  func.func @transform_0(%arg0: i32) -> (i32, i32) {
    %c0_i32 = arith.constant 0 : i32
    %c0_i32_0 = arith.constant 0 : i32
    return %arg0, %c0_i32 : i32, i32
  }
  func.func @transform_1(%arg0: i32) -> (i32, i32) {
    %c0_i32 = arith.constant 0 : i32
    %c0_i32_0 = arith.constant 0 : i32
    %c0_i32_1 = arith.constant 0 : i32
    return %c0_i32, %c0_i32_0 : i32, i32
  }
  func.func @transform_2(%arg0: i32) -> (i32, i32) {
    %c0_i32 = arith.constant 0 : i32
    %c0_i32_0 = arith.constant 0 : i32
    %c0_i32_1 = arith.constant 0 : i32
    return %c0_i32, %c0_i32_0 : i32, i32
  }
  func.func @transform_3(%arg0: i32) -> (i32, i32) {
    %c0_i32 = arith.constant 0 : i32
    %c0_i32_0 = arith.constant 0 : i32
    %c0_i32_1 = arith.constant 0 : i32
    return %c0_i32, %c0_i32_0 : i32, i32
  }
  func.func @transform_4(%arg0: i32) -> (i32, i32) {
    %c0_i32 = arith.constant 0 : i32
    %c0_i32_0 = arith.constant 0 : i32
    %c0_i32_1 = arith.constant 0 : i32
    return %c0_i32, %c0_i32_0 : i32, i32
  }
  func.func @transform_5(%arg0: i32) -> (i32, i32) {
    %c0_i32 = arith.constant 0 : i32
    %c0_i32_0 = arith.constant 0 : i32
    return %arg0, %c0_i32 : i32, i32
  }
}

</mosaic_0001>

<bundles_post_ra>
// kernel: actor_critic_forward.1
= control target key start
LH: loop header
LB: loop body
LE: loop exit
PB: predicated region body
PF: predicated region fallthrough
CT: control target
= control target key end

     0   :  { %10 = vsyncpa [#allocation3], 0  ;;  %s585_s0 = inlined_call_operand.hbm [shape: f32[8,32], index: 0, kind: input, shape index: {}]   ;;  %s586_s1 = inlined_call_operand.hbm [shape: bf16[32,128], index: 1, kind: input, shape index: {}]   ;;  %s587_s2 = inlined_call_operand.hbm [shape: bf16[128,128], index: 2, kind: input, shape index: {}]   ;;  %s588_s3 = inlined_call_operand.hbm [shape: bf16[128,128], index: 3, kind: input, shape index: {}]   ;;  %s589_s4 = inlined_call_operand.hbm [shape: f32[3,128], index: 4, kind: input, shape index: {}]   ;;  %s590_s5 = inlined_call_operand.vmem [shape: bf16[8,128], index: 5, kind: output, shape index: {}]  }
   0x1   :  { %11 = vsyncpa [#allocation5], 0  ;;  %s28_s20 = sshll.u32 %s586_s1, 4  ;;  %s29_s20 = int_to_ptr.hbm [resolvable:$true] %s28_s20 }
   0x2   :  { %12 = vsyncpa [#allocation8], 0  ;;  %s530_s21 = smov [#allocation4]   ;;  %s54_s25 = sshll.u32 %s588_s3, 4  ;;  %s55_s25 = int_to_ptr.hbm [resolvable:$true] %s54_s25 }
   0x3   :  { %s30_s22 = sshll.u32 %s530_s21, 4  ;;  %s531_s26 = smov 64   ;;  %s31_s22 = int_to_ptr.vmem [resolvable:$true] %s30_s22 }
   0x4   :  { %s532_s27 = smov 4   ;;  %s533_s28 = smov [#allocation7]  }
   0x5   :  { %36 = dma.hbm_to_vmem [thread:$0]  %s29_s20, 256, %s31_s22, [#allocation5], %s531_s26, %s531_s26, %s532_s27  }
   0x6   :  { %s56_s29 = sshll.u32 %s533_s28, 4  ;;  %s18_s7 = sshll.u32 %s585_s0, 4  ;;  %s57_s29 = int_to_ptr.vmem [resolvable:$true] %s56_s29  ;;  %s19_s7 = int_to_ptr.hbm [resolvable:$true] %s18_s7 }
   0x7   :  { %62 = dma.hbm_to_vmem [thread:$0]  %s55_s25, 1024, %s57_s29, [#allocation8], %s531_s26, %s531_s26, %s532_s27  }
   0x8   :  { %s41_s9 = sshll.u32 %s587_s2, 4  ;;  %s534_s10 = smov [#allocation2]   ;;  %s42_s9 = int_to_ptr.hbm [resolvable:$true] %s41_s9 }
   0x9   :  { %s20_s11 = sshll.u32 %s534_s10, 4  ;;  %s535_s3 = smov [#allocation6]   ;;  %s21_s11 = int_to_ptr.vmem [resolvable:$true] %s20_s11 }
   0xa   :  { %23 = dma.hbm_to_vmem [thread:$0]  %s19_s7, 128, %s21_s11, [#allocation3]  }
   0xb   :  { %s43_s12 = sshll.u32 %s535_s3, 4  ;;  %s68_s15 = sshll.u32 %s589_s4, 4  ;;  %s44_s12 = int_to_ptr.vmem [resolvable:$true] %s43_s12  ;;  %s69_s15 = int_to_ptr.hbm [resolvable:$true] %s68_s15 }
   0xc   :  { %49 = dma.hbm_to_vmem [thread:$0]  %s42_s9, 1024, %s44_s12, [#allocation5], %s531_s26, %s531_s26, %s532_s27  }
   0xd   :  { %s536_s0 = smov [#allocation9]  }
   0xe   :  { %s70_s16 = sshll.u32 %s536_s0, 4  ;;  %s71_s16 = int_to_ptr.vmem [resolvable:$true] %s70_s16 }
   0xf   :  { %73 = dma.hbm_to_vmem [thread:$0]  %s69_s15, 64, %s71_s16, [#allocation8]  }
  0x10   :  { %524 = dma.done.wait [#allocation3], 128  }
  0x11   :  { %525 = vsyncadd [#allocation3], 4294967168 }
  0x12   :  { %526 = dma.done.wait [#allocation5], 1280  }
  0x13   :  { %527 = vsyncadd [#allocation5], 4294966016 }
  0x14   :  { %528 = dma.done.wait [#allocation8], 1088  }
  0x15   :  { %529 = vsyncadd [#allocation8], 4294966208  ;;  %v377_v0 = vld [vmem:[#allocation4 + $0x8] sm:$0xff]  ;;  %v376_v2 = vld [vmem:[#allocation4] sm:$0xff]  ;;  %vm117_vm0 = vcmask 261120  }
  0x16   :  { %v385_v1 = vld [vmem:[#allocation6 + $0x38] sm:$0xff]  ;;  %127 = vmatpush.bf16.msra.mxu0 %v377_v0  ;;  %v95_v3 = vld [vmem:[#allocation2] sm:$0xff]  ;;  %v384_v4 = vld [vmem:[#allocation6 + $0x30] sm:$0xff] }
  0x17   :  { %201 = vmatpush.bf16.msra.mxu1 %v385_v1  ;;  %v96_v5 = vpack.c.bf16 %v95_v3, %v95_v3  ;;  %v383_v6 = vld [vmem:[#allocation6 + $0x28] sm:$0xff]  ;;  %v382_v7 = vld [vmem:[#allocation6 + $0x20] sm:$0xff]  ;;  %v381_v8 = vld [vmem:[#allocation6 + $0x18] sm:$0xff] }
  0x18   :  { %v380_v9 = vld [vmem:[#allocation6 + $0x10] sm:$0xff]  ;;  %v379_v10 = vld [vmem:[#allocation6 + $0x8] sm:$0xff]  ;;  %v378_v11 = vld [vmem:[#allocation6] sm:$0xff] }
  0x19   :  { %v393_v12 = vld [vmem:[#allocation7 + $0x38] sm:$0xff]  ;;  %v392_v13 = vld [vmem:[#allocation7 + $0x30] sm:$0xff]  ;;  %v391_v14 = vld [vmem:[#allocation7 + $0x28] sm:$0xff] }
  0x1a   :  { %128 = vmatpush.bf16.msra.mxu0 %v376_v2  ;;  %281 = vmatpush.bf16.msra.mxu2 %v393_v12  ;;  %v390_v15 = vld [vmem:[#allocation7 + $0x20] sm:$0xff]  ;;  %v389_v16 = vld [vmem:[#allocation7 + $0x18] sm:$0xff]  ;;  %v388_v17 = vld [vmem:[#allocation7 + $0x10] sm:$0xff] }
  0x1b   :  { %202 = vmatpush.bf16.msra.mxu1 %v384_v4  ;;  %v401_v18 = vld [vmem:[#allocation9] ss:$0 sm:$0xff]  ;;  %v387_v24 = vld [vmem:[#allocation7 + $0x8] sm:$0xff]  ;;  %v402_v26 = vld [vmem:[#allocation9 + $0x1] ss:$0 sm:$0xff] }
  0x1c   :  { %v386_v25 = vld [vmem:[#allocation7] sm:$0xff] }
  0x1d   :  { %311 = vmatmul.msk.bf16.vlgmr.msra.gmra.mxu0 %vm117_vm0, %v96_v5  ;;  %v403_v32 = vld [vmem:[#allocation9 + $0x2] ss:$0 sm:$0xff] }
  0x1e   :  { %282 = vmatpush.bf16.msra.mxu2 %v392_v13 }
  0x1f   :  { %203 = vmatpush.bf16.msra.mxu1 %v383_v6 }
  0x22   :  { %283 = vmatpush.bf16.msra.mxu2 %v391_v14 }
  0x23   :  { %204 = vmatpush.bf16.msra.mxu1 %v382_v7 }
  0x26   :  { %284 = vmatpush.bf16.msra.mxu2 %v390_v15 }
  0x27   :  { %205 = vmatpush.bf16.msra.mxu1 %v381_v8 }
  0x2a   :  { %285 = vmatpush.bf16.msra.mxu2 %v389_v16 }
  0x2b   :  { %206 = vmatpush.bf16.msra.mxu1 %v380_v9 }
  0x2e   :  { %286 = vmatpush.bf16.msra.mxu2 %v388_v17 }
  0x2f   :  { %207 = vmatpush.bf16.msra.mxu1 %v379_v10 }
  0x32   :  { %287 = vmatpush.bf16.msra.mxu2 %v387_v24 }
  0x33   :  { %208 = vmatpush.bf16.msra.mxu1 %v378_v11 }
  0x36   :  { %288 = vmatpush.bf16.msra.mxu2 %v386_v25 }
  0x9a   :  { %v130_v19 = vpop.f32.mrf.mxu0 }
  0x9b   :  { %v131_v20 = vadd.f32 %v401_v18, %v130_v19 }
  0x9d   :  { %v134_v21 = vmax.f32 %v131_v20, 0.0 }
  0x9f   :  { %v135_v22 = vpack.c.bf16 %v134_v21, %v134_v21 }
  0xa1   :  { %209 = vmatmul.bf16.vlgmr.msra.gmra.mxu1 %v135_v22 }
  0xa2   :  { %v132_v23 = vpop.f32.mrf.mxu0 }
 0x11e   :  { %v210_v27 = vpop.f32.mrf.mxu1 }
 0x11f   :  { %v211_v28 = vadd.f32 %v402_v26, %v210_v27 }
 0x121   :  { %v214_v29 = vmax.f32 %v211_v28, 0.0 }
 0x123   :  { %v215_v30 = vpack.c.bf16 %v214_v29, %v214_v29 }
 0x125   :  { %289 = vmatmul.bf16.vlgmr.msra.gmra.mxu2 %v215_v30 }
 0x126   :  { %v212_v31 = vpop.f32.mrf.mxu1 }
 0x1a8   :  { %v290_v33 = vpop.f32.mrf.mxu2 }
 0x1a9   :  { %v291_v34 = vadd.f32 %v403_v32, %v290_v33 }
 0x1ab   :  { %v294_v35 = vpack.c.bf16 %v291_v34, %v291_v34 }
 0x1ad   :  { %295 = vst [vmem:[%s590_s5] sm:$0xf] %v294_v35 }
 0x1b0   :  { %v292_v36 = vpop.f32.mrf.mxu2 }
 0x1b1   :  { %300 = vsyncpa [#allocation3], 1 }
 0x1b2   :  { %301 = vsyncpa [#allocation5], 1 }
 0x1b3   :  { %302 = vsyncpa [#allocation8], 1 }

// kernel: actor_critic_forward.1
= control target key start
LH: loop header
LB: loop body
LE: loop exit
PB: predicated region body
PF: predicated region fallthrough
CT: control target
= control target key end

     0   :  { %10 = vsyncpa [#allocation3], 0  ;;  %s585_s0 = inlined_call_operand.hbm [shape: f32[8,32], index: 0, kind: input, shape index: {}]   ;;  %s586_s1 = inlined_call_operand.hbm [shape: bf16[32,128], index: 1, kind: input, shape index: {}]   ;;  %s587_s2 = inlined_call_operand.hbm [shape: bf16[128,128], index: 2, kind: input, shape index: {}]   ;;  %s588_s3 = inlined_call_operand.hbm [shape: bf16[128,128], index: 3, kind: input, shape index: {}]   ;;  %s589_s4 = inlined_call_operand.hbm [shape: f32[3,128], index: 4, kind: input, shape index: {}]   ;;  %s590_s5 = inlined_call_operand.vmem [shape: bf16[8,128], index: 5, kind: output, shape index: {}]  }
   0x1   :  { %11 = vsyncpa [#allocation5], 0  ;;  %s28_s20 = sshll.u32 %s586_s1, 4  ;;  %s29_s20 = int_to_ptr.hbm [resolvable:$true] %s28_s20 }
   0x2   :  { %12 = vsyncpa [#allocation8], 0  ;;  %s530_s21 = smov [#allocation4]   ;;  %s54_s25 = sshll.u32 %s588_s3, 4  ;;  %s55_s25 = int_to_ptr.hbm [resolvable:$true] %s54_s25 }
   0x3   :  { %s30_s22 = sshll.u32 %s530_s21, 4  ;;  %s531_s26 = smov 64   ;;  %s31_s22 = int_to_ptr.vmem [resolvable:$true] %s30_s22 }
   0x4   :  { %s532_s27 = smov 4   ;;  %s533_s28 = smov [#allocation7]  }
   0x5   :  { %36 = dma.hbm_to_vmem [thread:$0]  %s29_s20, 256, %s31_s22, [#allocation5], %s531_s26, %s531_s26, %s532_s27  }
   0x6   :  { %s56_s29 = sshll.u32 %s533_s28, 4  ;;  %s18_s7 = sshll.u32 %s585_s0, 4  ;;  %s57_s29 = int_to_ptr.vmem [resolvable:$true] %s56_s29  ;;  %s19_s7 = int_to_ptr.hbm [resolvable:$true] %s18_s7 }
   0x7   :  { %62 = dma.hbm_to_vmem [thread:$0]  %s55_s25, 1024, %s57_s29, [#allocation8], %s531_s26, %s531_s26, %s532_s27  }
   0x8   :  { %s41_s9 = sshll.u32 %s587_s2, 4  ;;  %s534_s10 = smov [#allocation2]   ;;  %s42_s9 = int_to_ptr.hbm [resolvable:$true] %s41_s9 }
   0x9   :  { %s20_s11 = sshll.u32 %s534_s10, 4  ;;  %s535_s3 = smov [#allocation6]   ;;  %s21_s11 = int_to_ptr.vmem [resolvable:$true] %s20_s11 }
   0xa   :  { %23 = dma.hbm_to_vmem [thread:$0]  %s19_s7, 128, %s21_s11, [#allocation3]  }
   0xb   :  { %s43_s12 = sshll.u32 %s535_s3, 4  ;;  %s68_s15 = sshll.u32 %s589_s4, 4  ;;  %s44_s12 = int_to_ptr.vmem [resolvable:$true] %s43_s12  ;;  %s69_s15 = int_to_ptr.hbm [resolvable:$true] %s68_s15 }
   0xc   :  { %49 = dma.hbm_to_vmem [thread:$0]  %s42_s9, 1024, %s44_s12, [#allocation5], %s531_s26, %s531_s26, %s532_s27  }
   0xd   :  { %s536_s0 = smov [#allocation9]  }
   0xe   :  { %s70_s16 = sshll.u32 %s536_s0, 4  ;;  %s71_s16 = int_to_ptr.vmem [resolvable:$true] %s70_s16 }
   0xf   :  { %73 = dma.hbm_to_vmem [thread:$0]  %s69_s15, 64, %s71_s16, [#allocation8]  }
  0x10   :  { %524 = dma.done.wait [#allocation3], 128  }
  0x11   :  { %525 = vsyncadd [#allocation3], 4294967168 }
  0x12   :  { %526 = dma.done.wait [#allocation5], 1280  }
  0x13   :  { %527 = vsyncadd [#allocation5], 4294966016 }
  0x14   :  { %528 = dma.done.wait [#allocation8], 1088  }
  0x15   :  { %529 = vsyncadd [#allocation8], 4294966208  ;;  %v377_v0 = vld [vmem:[#allocation4 + $0x8] sm:$0xff]  ;;  %v376_v2 = vld [vmem:[#allocation4] sm:$0xff]  ;;  %vm117_vm0 = vcmask 261120  }
  0x16   :  { %v385_v1 = vld [vmem:[#allocation6 + $0x38] sm:$0xff]  ;;  %127 = vmatpush.bf16.msra.mxu0 %v377_v0  ;;  %v95_v3 = vld [vmem:[#allocation2] sm:$0xff]  ;;  %v384_v4 = vld [vmem:[#allocation6 + $0x30] sm:$0xff] }
  0x17   :  { %201 = vmatpush.bf16.msra.mxu1 %v385_v1  ;;  %v96_v5 = vpack.c.bf16 %v95_v3, %v95_v3  ;;  %v383_v6 = vld [vmem:[#allocation6 + $0x28] sm:$0xff]  ;;  %v382_v7 = vld [vmem:[#allocation6 + $0x20] sm:$0xff]  ;;  %v381_v8 = vld [vmem:[#allocation6 + $0x18] sm:$0xff] }
  0x18   :  { %v380_v9 = vld [vmem:[#allocation6 + $0x10] sm:$0xff]  ;;  %v379_v10 = vld [vmem:[#allocation6 + $0x8] sm:$0xff]  ;;  %v378_v11 = vld [vmem:[#allocation6] sm:$0xff] }
  0x19   :  { %v393_v12 = vld [vmem:[#allocation7 + $0x38] sm:$0xff]  ;;  %v392_v13 = vld [vmem:[#allocation7 + $0x30] sm:$0xff]  ;;  %v391_v14 = vld [vmem:[#allocation7 + $0x28] sm:$0xff] }
  0x1a   :  { %128 = vmatpush.bf16.msra.mxu0 %v376_v2  ;;  %281 = vmatpush.bf16.msra.mxu2 %v393_v12  ;;  %v390_v15 = vld [vmem:[#allocation7 + $0x20] sm:$0xff]  ;;  %v389_v16 = vld [vmem:[#allocation7 + $0x18] sm:$0xff]  ;;  %v388_v17 = vld [vmem:[#allocation7 + $0x10] sm:$0xff] }
  0x1b   :  { %202 = vmatpush.bf16.msra.mxu1 %v384_v4  ;;  %v401_v18 = vld [vmem:[#allocation9] ss:$0 sm:$0xff]  ;;  %v387_v24 = vld [vmem:[#allocation7 + $0x8] sm:$0xff]  ;;  %v402_v26 = vld [vmem:[#allocation9 + $0x1] ss:$0 sm:$0xff] }
  0x1c   :  { %v386_v25 = vld [vmem:[#allocation7] sm:$0xff] }
  0x1d   :  { %311 = vmatmul.msk.bf16.vlgmr.msra.gmra.mxu0 %vm117_vm0, %v96_v5  ;;  %v403_v32 = vld [vmem:[#allocation9 + $0x2] ss:$0 sm:$0xff] }
  0x1e   :  { %282 = vmatpush.bf16.msra.mxu2 %v392_v13 }
  0x1f   :  { %203 = vmatpush.bf16.msra.mxu1 %v383_v6 }
  0x22   :  { %283 = vmatpush.bf16.msra.mxu2 %v391_v14 }
  0x23   :  { %204 = vmatpush.bf16.msra.mxu1 %v382_v7 }
  0x26   :  { %284 = vmatpush.bf16.msra.mxu2 %v390_v15 }
  0x27   :  { %205 = vmatpush.bf16.msra.mxu1 %v381_v8 }
  0x2a   :  { %285 = vmatpush.bf16.msra.mxu2 %v389_v16 }
  0x2b   :  { %206 = vmatpush.bf16.msra.mxu1 %v380_v9 }
  0x2e   :  { %286 = vmatpush.bf16.msra.mxu2 %v388_v17 }
  0x2f   :  { %207 = vmatpush.bf16.msra.mxu1 %v379_v10 }
  0x32   :  { %287 = vmatpush.bf16.msra.mxu2 %v387_v24 }
  0x33   :  { %208 = vmatpush.bf16.msra.mxu1 %v378_v11 }
  0x36   :  { %288 = vmatpush.bf16.msra.mxu2 %v386_v25 }
  0x9a   :  { %v130_v19 = vpop.f32.mrf.mxu0 }
  0x9b   :  { %v131_v20 = vadd.f32 %v401_v18, %v130_v19 }
  0x9d   :  { %v134_v21 = vmax.f32 %v131_v20, 0.0 }
  0x9f   :  { %v135_v22 = vpack.c.bf16 %v134_v21, %v134_v21 }
  0xa1   :  { %209 = vmatmul.bf16.vlgmr.msra.gmra.mxu1 %v135_v22 }
  0xa2   :  { %v132_v23 = vpop.f32.mrf.mxu0 }
 0x11e   :  { %v210_v27 = vpop.f32.mrf.mxu1 }
 0x11f   :  { %v211_v28 = vadd.f32 %v402_v26, %v210_v27 }
 0x121   :  { %v214_v29 = vmax.f32 %v211_v28, 0.0 }
 0x123   :  { %v215_v30 = vpack.c.bf16 %v214_v29, %v214_v29 }
 0x125   :  { %289 = vmatmul.bf16.vlgmr.msra.gmra.mxu2 %v215_v30 }
 0x126   :  { %v212_v31 = vpop.f32.mrf.mxu1 }
 0x1a8   :  { %v290_v33 = vpop.f32.mrf.mxu2 }
 0x1a9   :  { %v291_v34 = vadd.f32 %v403_v32, %v290_v33 }
 0x1ab   :  { %v294_v35 = vpack.c.bf16 %v291_v34, %v291_v34 }
 0x1ad   :  { %295 = vst [vmem:[%s590_s5] sm:$0xf] %v294_v35 }
 0x1b0   :  { %v292_v36 = vpop.f32.mrf.mxu2 }
 0x1b1   :  { %300 = vsyncpa [#allocation3], 1 }
 0x1b2   :  { %301 = vsyncpa [#allocation5], 1 }
 0x1b3   :  { %302 = vsyncpa [#allocation8], 1 }

</bundles_post_ra>
